<compile_context>
chip_gen: v7x
topology: tpu7x:2x2x1
jax: 0.10.0
libtpu: 0.0.40
codegen_flags: <defaults>
</compile_context>

<pallas_src>
import functools

import jax
import jax.numpy as jnp
from jax.experimental import pallas as pl
from jax.experimental.pallas import tpu as pltpu

LANE = 128     # f32 lane tile (last dim)
SUBLANE = 8    # f32 sublane tile (second-to-last dim)


def _round_up(n, m):
    return ((n + m - 1) // m) * m


def _fused_mlp_kernel(*refs):
    # refs = (x_ref, w0_ref, b0_ref, w1_ref, b1_ref, ..., o_ref)
    # x_ref: f32 (B_pad, in_pad); w_i: bf16 (in_pad_i, out_pad_i);
    # b_i: f32 (1, out_pad_i); o_ref: f32 (B_pad, out_pad_last).
    # Everything is whole-array and VMEM-resident; intermediate activations
    # never leave vregs/VMEM.
    x_ref = refs[0]
    o_ref = refs[-1]
    layer_refs = refs[1:-1]

    y = x_ref[...]                                            # f32
    for i in range(0, len(layer_refs), 2):
        w_ref = layer_refs[i]
        b_ref = layer_refs[i + 1]
        # bf16 operands on the MXU, f32 accumulation, f32 bias add on the VPU.
        y = jnp.dot(y.astype(jnp.bfloat16), w_ref[...],
                    preferred_element_type=jnp.float32) + b_ref[...]
    o_ref[...] = y.astype(o_ref.dtype)


def fused_mlp(x_pad, layers):
    """Run the whole Linear stack in one un-pipelined Pallas kernel.

    x_pad:  (B_pad, in_pad) float32, already padded to (8, 128) tiles.
    layers: tuple of (w, b) with w: bf16 (in_pad, out_pad) [pre-transposed and
            zero-padded at init], b: f32 (1, out_pad).
    Returns the padded output (B_pad, out_pad_last) float32.
    """
    b_pad = x_pad.shape[0]
    out_pad = layers[-1][0].shape[1]

    flat_inputs = [x_pad]
    for (w, bias2d) in layers:
        flat_inputs.append(w)
        flat_inputs.append(bias2d)

    vmem_spec = pl.BlockSpec(memory_space=pltpu.MemorySpace.VMEM)
    return pl.pallas_call(
        _fused_mlp_kernel,
        out_shape=jax.ShapeDtypeStruct((b_pad, out_pad), jnp.float32),
        in_specs=[vmem_spec] * len(flat_inputs),
        out_specs=vmem_spec,
    )(*flat_inputs)


def init_neural_net_params(param_dict, key):
    """Build the same Linear stack as neuralNet.__init__.

    Weights use the PyTorch (out, in) layout and default uniform init range,
    then are transposed ONCE to (in, out), zero-padded so every dimension is a
    multiple of 128 lanes, and cast to bfloat16.  Biases stay f32, zero-padded
    to the same output width.  All padding is zeros so the padded forward is
    numerically identical (up to bf16 rounding) on the real columns.
    """
    sizes = (
        [(param_dict["input_size"], param_dict["hidden_size"])]
        + [(param_dict["hidden_size"], param_dict["hidden_size"])
           for _ in range(param_dict["num_layers"])]
        + [(param_dict["hidden_size"], param_dict["output_size"])]
    )
    layers = []
    for fan_in, fan_out in sizes:
        key, wk, bk = jax.random.split(key, 3)
        bound = 1.0 / jnp.sqrt(fan_in)
        w = jax.random.uniform(wk, (fan_out, fan_in), jnp.float32, -bound, bound)
        b = jax.random.uniform(bk, (fan_out,), jnp.float32, -bound, bound)

        in_pad = _round_up(fan_in, LANE)
        out_pad = _round_up(fan_out, LANE)
        w_io = jnp.pad(w.T, ((0, in_pad - fan_in), (0, out_pad - fan_out)))
        b2 = jnp.pad(b.reshape(1, fan_out), ((0, 0), (0, out_pad - fan_out)))
        layers.append((w_io.astype(jnp.bfloat16), b2))
    return tuple(layers)


@functools.partial(jax.jit, static_argnums=(2,))
def neural_net_forward(x, layers, output_size):
    b, in_features = x.shape
    b_pad = _round_up(b, SUBLANE)
    in_pad = layers[0][0].shape[0]
    # Zero-pad rows (sublanes) and input columns (lanes); zeros are inert.
    x_pad = jnp.pad(x, ((0, b_pad - b), (0, in_pad - in_features)))
    y_pad = fused_mlp(x_pad, layers)
    # Slice away row/lane padding.  If the consumer can read the first
    # `output_size` columns of the padded output directly, drop this slice.
    return y_pad[:b, :output_size]


if __name__ == "__main__":
    param_dict = {
        "input_size": 32,
        "hidden_size": 32,
        "num_layers": 2,
        "output_size": 8,
    }

    key = jax.random.PRNGKey(0)
    key, xk = jax.random.split(key)
    batch = 2
    x = jax.random.normal(xk, (batch, param_dict["input_size"]), jnp.float32)

    layers = init_neural_net_params(param_dict, key)

    y = neural_net_forward(x, layers, param_dict["output_size"])
    jax.block_until_ready(y)

    # Reference check against plain JAX (same math as a PyTorch nn.Linear
    # stack).  Weights are stored in bf16, so the kernel's bf16-operand /
    # f32-accumulate dots need a looser tolerance than a pure-f32 chain.
    in_features = x.shape[1]
    y_ref = jnp.pad(x, ((0, 0), (0, layers[0][0].shape[0] - in_features)))
    for (w_io, b2) in layers:
        y_ref = y_ref @ w_io.astype(jnp.float32) + b2
    y_ref = y_ref[:, :param_dict["output_size"]]

    assert y.shape == (batch, param_dict["output_size"])
    assert jnp.allclose(y, y_ref, atol=1e-2, rtol=1e-2)

    print("KERNEL_OK")
</pallas_src>

<mosaic_0001>
module attributes {stable_mosaic.version = 11 : i64} {
  func.func @_fused_mlp_kernel(%arg0: memref<8x128xf32, #tpu.memory_space<vmem>>, %arg1: memref<128x128xbf16, #tpu.memory_space<vmem>>, %arg2: memref<1x128xf32, #tpu.memory_space<vmem>>, %arg3: memref<128x128xbf16, #tpu.memory_space<vmem>>, %arg4: memref<1x128xf32, #tpu.memory_space<vmem>>, %arg5: memref<128x128xbf16, #tpu.memory_space<vmem>>, %arg6: memref<1x128xf32, #tpu.memory_space<vmem>>, %arg7: memref<128x128xbf16, #tpu.memory_space<vmem>>, %arg8: memref<1x128xf32, #tpu.memory_space<vmem>>, %arg9: memref<8x128xf32, #tpu.memory_space<vmem>>) attributes {dimension_semantics = [], scalar_prefetch = 0 : i64, scratch_operands = 0 : i64, tpu.core_type = #tpu.core_type<tc>} {
    %c0 = arith.constant 0 : index
    %c0_0 = arith.constant 0 : index
    %0 = vector.load %arg0[%c0, %c0_0] : memref<8x128xf32, #tpu.memory_space<vmem>>, vector<8x128xf32>
    %1 = arith.truncf %0 : vector<8x128xf32> to vector<8x128xbf16>
    %c0_1 = arith.constant 0 : index
    %c0_2 = arith.constant 0 : index
    %2 = vector.load %arg1[%c0_1, %c0_2] : memref<128x128xbf16, #tpu.memory_space<vmem>>, vector<128x128xbf16>
    %cst = arith.constant dense<0.000000e+00> : vector<8x128xf32>
    %3 = tpu.matmul %1, %2, %cst {dimension_numbers = #tpu.dot_dimension_numbers<[1], [0], [0], [1], [0, 0, 1, 1], [], []>} : vector<8x128xbf16>, vector<128x128xbf16>, vector<8x128xf32> -> vector<8x128xf32>
    %c0_3 = arith.constant 0 : index
    %c0_4 = arith.constant 0 : index
    %4 = vector.load %arg2[%c0_3, %c0_4] : memref<1x128xf32, #tpu.memory_space<vmem>>, vector<1x128xf32>
    %5 = vector.broadcast %4 : vector<1x128xf32> to vector<8x128xf32>
    %6 = arith.addf %3, %5 : vector<8x128xf32>
    %7 = arith.truncf %6 : vector<8x128xf32> to vector<8x128xbf16>
    %c0_5 = arith.constant 0 : index
    %c0_6 = arith.constant 0 : index
    %8 = vector.load %arg3[%c0_5, %c0_6] : memref<128x128xbf16, #tpu.memory_space<vmem>>, vector<128x128xbf16>
    %cst_7 = arith.constant dense<0.000000e+00> : vector<8x128xf32>
    %9 = tpu.matmul %7, %8, %cst_7 {dimension_numbers = #tpu.dot_dimension_numbers<[1], [0], [0], [1], [0, 0, 1, 1], [], []>} : vector<8x128xbf16>, vector<128x128xbf16>, vector<8x128xf32> -> vector<8x128xf32>
    %c0_8 = arith.constant 0 : index
    %c0_9 = arith.constant 0 : index
    %10 = vector.load %arg4[%c0_8, %c0_9] : memref<1x128xf32, #tpu.memory_space<vmem>>, vector<1x128xf32>
    %11 = vector.broadcast %10 : vector<1x128xf32> to vector<8x128xf32>
    %12 = arith.addf %9, %11 : vector<8x128xf32>
    %13 = arith.truncf %12 : vector<8x128xf32> to vector<8x128xbf16>
    %c0_10 = arith.constant 0 : index
    %c0_11 = arith.constant 0 : index
    %14 = vector.load %arg5[%c0_10, %c0_11] : memref<128x128xbf16, #tpu.memory_space<vmem>>, vector<128x128xbf16>
    %cst_12 = arith.constant dense<0.000000e+00> : vector<8x128xf32>
    %15 = tpu.matmul %13, %14, %cst_12 {dimension_numbers = #tpu.dot_dimension_numbers<[1], [0], [0], [1], [0, 0, 1, 1], [], []>} : vector<8x128xbf16>, vector<128x128xbf16>, vector<8x128xf32> -> vector<8x128xf32>
    %c0_13 = arith.constant 0 : index
    %c0_14 = arith.constant 0 : index
    %16 = vector.load %arg6[%c0_13, %c0_14] : memref<1x128xf32, #tpu.memory_space<vmem>>, vector<1x128xf32>
    %17 = vector.broadcast %16 : vector<1x128xf32> to vector<8x128xf32>
    %18 = arith.addf %15, %17 : vector<8x128xf32>
    %19 = arith.truncf %18 : vector<8x128xf32> to vector<8x128xbf16>
    %c0_15 = arith.constant 0 : index
    %c0_16 = arith.constant 0 : index
    %20 = vector.load %arg7[%c0_15, %c0_16] : memref<128x128xbf16, #tpu.memory_space<vmem>>, vector<128x128xbf16>
    %cst_17 = arith.constant dense<0.000000e+00> : vector<8x128xf32>
    %21 = tpu.matmul %19, %20, %cst_17 {dimension_numbers = #tpu.dot_dimension_numbers<[1], [0], [0], [1], [0, 0, 1, 1], [], []>} : vector<8x128xbf16>, vector<128x128xbf16>, vector<8x128xf32> -> vector<8x128xf32>
    %c0_18 = arith.constant 0 : index
    %c0_19 = arith.constant 0 : index
    %22 = vector.load %arg8[%c0_18, %c0_19] : memref<1x128xf32, #tpu.memory_space<vmem>>, vector<1x128xf32>
    %23 = vector.broadcast %22 : vector<1x128xf32> to vector<8x128xf32>
    %24 = arith.addf %21, %23 : vector<8x128xf32>
    %c0_20 = arith.constant 0 : index
    %c0_21 = arith.constant 0 : index
    %25 = vector.load %arg9[%c0_20, %c0_21] : memref<8x128xf32, #tpu.memory_space<vmem>>, vector<8x128xf32>
    tpu.vector_store %arg9[%c0_20, %c0_21], %24 {strides = array<i32>} : memref<8x128xf32, #tpu.memory_space<vmem>>, vector<8x128xf32>,
    return
  }
}

</mosaic_0001>

<bundles_post_ra>
// kernel: neural_net_forward.1
= control target key start
LH: loop header
LB: loop body
LE: loop exit
PB: predicated region body
PF: predicated region fallthrough
CT: control target
= control target key end

     0   :  { %14 = vsyncpa [#allocation3], 0  ;;  %s1021_s0 = inlined_call_operand.vmem [shape: f32[8,128], index: 0, kind: input, shape index: {}]   ;;  %s1022_s1 = inlined_call_operand.hbm [shape: bf16[128,128], index: 1, kind: input, shape index: {}]   ;;  %s1023_s2 = inlined_call_operand.vmem [shape: f32[1,128], index: 2, kind: input, shape index: {}]   ;;  %s1024_s3 = inlined_call_operand.hbm [shape: bf16[128,128], index: 3, kind: input, shape index: {}]   ;;  %s1025_s4 = inlined_call_operand.vmem [shape: f32[1,128], index: 4, kind: input, shape index: {}]   ;;  %s1026_s5 = inlined_call_operand.hbm [shape: bf16[128,128], index: 5, kind: input, shape index: {}]   ;;  %s1027_s6 = inlined_call_operand.vmem [shape: f32[1,128], index: 6, kind: input, shape index: {}]   ;;  %s1028_s7 = inlined_call_operand.hbm [shape: bf16[128,128], index: 7, kind: input, shape index: {}]   ;;  %s1029_s8 = inlined_call_operand.vmem [shape: f32[1,128], index: 8, kind: input, shape index: {}]   ;;  %s1030_s9 = inlined_call_operand.vmem [shape: f32[8,128], index: 9, kind: output, shape index: {}]  }
   0x1   :  { %15 = vsyncpa [#allocation5], 0 }
   0x2   :  { %16 = vsyncpa [#allocation8], 0  ;;  %s831_s30 = smov [#allocation4]   ;;  %s832_s11 = smov [#allocation2]  }
   0x3   :  { %s38_s10 = sshll.u32 %s831_s30, 4  ;;  %s24_s12 = sshll.u32 %s832_s11, 4  ;;  %s39_s10 = int_to_ptr.vmem [resolvable:$true] %s38_s10  ;;  %s889_s12 = int_to_ptr.vmem [resolvable:$true] %s24_s12 }
   0x4   :  { %s737_s15 = scalar_lea.hbm %s1024_s3, 1024 }
   0x5   :  { %p738_p0 = scmp.ne.s32.totalorder %s1024_s3, %s737_s15  ;;  %p741_p1 = scmp.lt.u32.totalorder %s737_s15, %s1024_s3 }
   0x7   :  { %p743_p2 = pnand %p741_p1, %p738_p0 }
   0x9   :  { %746 = shalt.err (!%p743_p2)
}
   0xa   :  { %s747_s20 = scalar_lea.vmem %s39_s10, 1024  ;;  %p752_p4 = scmp.lt.s32.totalorder %s39_s10, %s39_s10 }
   0xb   :  { %p748_p3 = scmp.ne.s32.totalorder %s39_s10, %s747_s20  ;;  %p753_p5 = scmp.lt.s32.totalorder %s747_s20, %s747_s20 }
   0xd   :  { %p754_p6 = por %p753_p5, %p752_p4 }
   0xf   :  { %p755_p7 = pnand %p754_p6, %p748_p3 }
  0x11   :  { %758 = shalt.err (!%p755_p7)
}
  0x12   :  { %s833_s21 = smov 64   ;;  %s834_s22 = smov 4  }
  0x13   :  { %44 = dma.hbm_to_vmem [thread:$0]  %s1024_s3, 1024, %s39_s10, [#allocation5], %s833_s21, %s833_s21, %s834_s22  }
  0x14   :  { %s759_s27 = scalar_lea.hbm %s1022_s1, 1024 }
  0x15   :  { %p760_p8 = scmp.ne.s32.totalorder %s1022_s1, %s759_s27  ;;  %p763_p9 = scmp.lt.u32.totalorder %s759_s27, %s1022_s1 }
  0x17   :  { %p765_p10 = pnand %p763_p9, %p760_p8 }
  0x19   :  { %768 = shalt.err (!%p765_p10)
}
  0x1a   :  { %s769_s13 = scalar_lea.vmem %s889_s12, 1024  ;;  %p774_p12 = scmp.lt.s32.totalorder %s889_s12, %s889_s12 }
  0x1b   :  { %p770_p11 = scmp.ne.s32.totalorder %s889_s12, %s769_s13  ;;  %p775_p13 = scmp.lt.s32.totalorder %s769_s13, %s769_s13 }
  0x1d   :  { %p776_p0 = por %p775_p13, %p774_p12 }
  0x1f   :  { %p777_p1 = pnand %p776_p0, %p770_p11 }
  0x21   :  { %780 = shalt.err (!%p777_p1)
}
  0x22   :  { %30 = dma.hbm_to_vmem [thread:$0]  %s1022_s1, 1024, %s889_s12, [#allocation3], %s833_s21, %s833_s21, %s834_s22  }
  0x23   :  { %s835_s14 = smov [#allocation6]   ;;  %s836_s16 = smov [#allocation7]  }
  0x24   :  { %s52_s15 = sshll.u32 %s835_s14, 4  ;;  %s66_s17 = sshll.u32 %s836_s16, 4  ;;  %s53_s15 = int_to_ptr.vmem [resolvable:$true] %s52_s15  ;;  %s926_s17 = int_to_ptr.vmem [resolvable:$true] %s66_s17 }
  0x25   :  { %s781_s20 = scalar_lea.hbm %s1026_s5, 1024 }
  0x26   :  { %p782_p2 = scmp.ne.s32.totalorder %s1026_s5, %s781_s20  ;;  %p785_p3 = scmp.lt.u32.totalorder %s781_s20, %s1026_s5 }
  0x28   :  { %p787_p4 = pnand %p785_p3, %p782_p2 }
  0x2a   :  { %790 = shalt.err (!%p787_p4)
}
  0x2b   :  { %s791_s1 = scalar_lea.vmem %s53_s15, 1024  ;;  %p796_p6 = scmp.lt.s32.totalorder %s53_s15, %s53_s15 }
  0x2c   :  { %p792_p5 = scmp.ne.s32.totalorder %s53_s15, %s791_s1  ;;  %p797_p7 = scmp.lt.s32.totalorder %s791_s1, %s791_s1 }
  0x2e   :  { %p798_p8 = por %p797_p7, %p796_p6 }
  0x30   :  { %p799_p9 = pnand %p798_p8, %p792_p5 }
  0x32   :  { %802 = shalt.err (!%p799_p9)
}
  0x33   :  { %58 = dma.hbm_to_vmem [thread:$0]  %s1026_s5, 1024, %s53_s15, [#allocation5], %s833_s21, %s833_s21, %s834_s22  }
  0x34   :  { %s803_s30 = scalar_lea.hbm %s1028_s7, 1024 }
  0x35   :  { %p804_p10 = scmp.ne.s32.totalorder %s1028_s7, %s803_s30  ;;  %p807_p11 = scmp.lt.u32.totalorder %s803_s30, %s1028_s7 }
  0x37   :  { %p809_p12 = pnand %p807_p11, %p804_p10 }
  0x39   :  { %812 = shalt.err (!%p809_p12)
}
  0x3a   :  { %s813_s14 = scalar_lea.vmem %s926_s17, 1024  ;;  %p818_p0 = scmp.lt.s32.totalorder %s926_s17, %s926_s17 }
  0x3b   :  { %p814_p13 = scmp.ne.s32.totalorder %s926_s17, %s813_s14  ;;  %p819_p1 = scmp.lt.s32.totalorder %s813_s14, %s813_s14 }
  0x3d   :  { %p820_p2 = por %p819_p1, %p818_p0 }
  0x3f   :  { %p821_p3 = pnand %p820_p2, %p814_p13 }
  0x41   :  { %824 = shalt.err (!%p821_p3)
}
  0x42   :  { %72 = dma.hbm_to_vmem [thread:$0]  %s1028_s7, 1024, %s926_s17, [#allocation8], %s833_s21, %s833_s21, %s834_s22  }
  0x43   :  { %825 = dma.done.wait [#allocation3], 1024  }
  0x44   :  { %826 = vsyncadd [#allocation3], 4294966272 }
  0x45   :  { %827 = dma.done.wait [#allocation5], 2048  }
  0x46   :  { %828 = vsyncadd [#allocation5], 4294965248 }
  0x47   :  { %829 = dma.done.wait [#allocation8], 1024  }
  0x48   :  { %830 = vsyncadd [#allocation8], 4294966272  ;;  %v837_v0 = vmov 0.0   ;;  %vm838_vm0 = vmmov 0   ;;  %v705_v1 = vld [vmem:[#allocation2] sm:$0xff]   ;;  %v706_v2 = vld [vmem:[#allocation2 + $0x8] sm:$0xff]  }
  0x49   :  { %617 = vmatprep.subr.bf16.mxu0 %v837_v0  ;;  %633 = vmatprep.mubr.msk.bf16.mxu0 %vm838_vm0, %v837_v0  ;;  %v707_v3 = vld [vmem:[#allocation2 + $0x10] sm:$0xff]   ;;  %v713_v4 = vld [vmem:[#allocation4] sm:$0xff]   ;;  %v708_v5 = vld [vmem:[#allocation2 + $0x18] sm:$0xff]  }
  0x4a   :  { %637 = vmatprep.subr.bf16.mxu1 %v837_v0  ;;  %653 = vmatprep.mubr.msk.bf16.mxu1 %vm838_vm0, %v837_v0  ;;  %v714_v6 = vld [vmem:[#allocation4 + $0x8] sm:$0xff]   ;;  %v709_v7 = vld [vmem:[#allocation2 + $0x20] sm:$0xff]   ;;  %v715_v8 = vld [vmem:[#allocation4 + $0x10] sm:$0xff]  }
  0x4b   :  { %618 = vmatpush3.bf16.msra.mxu0 %v705_v1  ;;  %638 = vmatpush3.bf16.msra.mxu1 %v713_v4  ;;  %v710_v9 = vld [vmem:[#allocation2 + $0x28] sm:$0xff]   ;;  %v716_v10 = vld [vmem:[#allocation4 + $0x18] sm:$0xff]   ;;  %v711_v11 = vld [vmem:[#allocation2 + $0x30] sm:$0xff]  }
  0x4c   :  { %619 = vmatprep.subr.bf16.mxu0 %v837_v0  ;;  %639 = vmatprep.subr.bf16.mxu1 %v837_v0  ;;  %v717_v12 = vld [vmem:[#allocation4 + $0x20] sm:$0xff]   ;;  %v712_v13 = vld [vmem:[#allocation2 + $0x38] sm:$0xff]   ;;  %v718_v15 = vld [vmem:[#allocation4 + $0x28] sm:$0xff]  }
  0x4d   :  { %v88_v14 = vld [vmem:[%s1021_s0] sm:$0xff]  ;;  %v719_v17 = vld [vmem:[#allocation4 + $0x30] sm:$0xff]   ;;  %v720_v18 = vld [vmem:[#allocation4 + $0x38] sm:$0xff]  }
  0x4e   :  { %v89_v16 = vpack.c.bf16 %v88_v14, %v88_v14  ;;  %v721_v19 = vld [vmem:[#allocation6] sm:$0xff]   ;;  %v722_v20 = vld [vmem:[#allocation6 + $0x8] sm:$0xff]   ;;  %v723_v21 = vld [vmem:[#allocation6 + $0x10] sm:$0xff]  }
  0x4f   :  { %620 = vmatpush3.bf16.msra.mxu0 %v706_v2  ;;  %640 = vmatpush3.bf16.msra.mxu1 %v714_v6  ;;  %v724_v22 = vld [vmem:[#allocation6 + $0x18] sm:$0xff]   ;;  %v725_v23 = vld [vmem:[#allocation6 + $0x20] sm:$0xff]   ;;  %v726_v24 = vld [vmem:[#allocation6 + $0x28] sm:$0xff]  }
  0x50   :  { %621 = vmatprep.subr.bf16.mxu0 %v837_v0  ;;  %641 = vmatprep.subr.bf16.mxu1 %v837_v0  ;;  %v727_v25 = vld [vmem:[#allocation6 + $0x30] sm:$0xff]   ;;  %v545_v26 = vld [vmem:[%s1023_s2] ss:$0 sm:$0xff]  ;;  %v728_v33 = vld [vmem:[#allocation6 + $0x38] sm:$0xff]  }
  0x51   :  { %v729_v34 = vld [vmem:[#allocation7] sm:$0xff]   ;;  %v730_v35 = vld [vmem:[#allocation7 + $0x8] sm:$0xff]   ;;  %v731_v36 = vld [vmem:[#allocation7 + $0x10] sm:$0xff]  }
  0x52   :  { %v732_v37 = vld [vmem:[#allocation7 + $0x18] sm:$0xff]   ;;  %v733_v38 = vld [vmem:[#allocation7 + $0x20] sm:$0xff]   ;;  %v734_v39 = vld [vmem:[#allocation7 + $0x28] sm:$0xff]  }
  0x53   :  { %622 = vmatpush3.bf16.msra.mxu0 %v707_v3  ;;  %642 = vmatpush3.bf16.msra.mxu1 %v715_v8  ;;  %v735_v40 = vld [vmem:[#allocation7 + $0x30] sm:$0xff]   ;;  %v554_v41 = vld [vmem:[%s1025_s4] ss:$0 sm:$0xff]  ;;  %v736_v48 = vld [vmem:[#allocation7 + $0x38] sm:$0xff]  }
  0x54   :  { %623 = vmatprep.subr.bf16.mxu0 %v837_v0  ;;  %643 = vmatprep.subr.bf16.mxu1 %v837_v0  ;;  %v563_v49 = vld [vmem:[%s1027_s6] ss:$0 sm:$0xff] }
  0x55   :  { %v572_v56 = vld [vmem:[%s1029_s8] ss:$0 sm:$0xff] }
  0x57   :  { %624 = vmatpush3.bf16.msra.mxu0 %v708_v5  ;;  %644 = vmatpush3.bf16.msra.mxu1 %v716_v10 }
  0x58   :  { %625 = vmatprep.subr.bf16.mxu0 %v837_v0  ;;  %645 = vmatprep.subr.bf16.mxu1 %v837_v0 }
  0x5b   :  { %626 = vmatpush3.bf16.msra.mxu0 %v709_v7  ;;  %646 = vmatpush3.bf16.msra.mxu1 %v717_v12 }
  0x5c   :  { %627 = vmatprep.subr.bf16.mxu0 %v837_v0  ;;  %647 = vmatprep.subr.bf16.mxu1 %v837_v0 }
  0x5f   :  { %628 = vmatpush3.bf16.msra.mxu0 %v710_v9  ;;  %648 = vmatpush3.bf16.msra.mxu1 %v718_v15 }
  0x60   :  { %629 = vmatprep.subr.bf16.mxu0 %v837_v0  ;;  %649 = vmatprep.subr.bf16.mxu1 %v837_v0 }
  0x63   :  { %630 = vmatpush3.bf16.msra.mxu0 %v711_v11  ;;  %650 = vmatpush3.bf16.msra.mxu1 %v719_v17 }
  0x64   :  { %631 = vmatprep.subr.bf16.mxu0 %v837_v0  ;;  %651 = vmatprep.subr.bf16.mxu1 %v837_v0 }
  0x67   :  { %632 = vmatpush3.bf16.msra.mxu0 %v712_v13  ;;  %652 = vmatpush3.bf16.msra.mxu1 %v720_v18 }
  0x68   :  { %657 = vmatprep.subr.bf16.mxu0 %v837_v0  ;;  %677 = vmatprep.subr.bf16.mxu1 %v837_v0 }
  0x6a   :  { %634 = vmatmul.mubr.bf16.vlgmr.msra.gmra.mrb[0].mxu0 %v89_v16 }
  0x6b   :  { %673 = vmatprep.mubr.msk.bf16.mxu0 %vm838_vm0, %v837_v0  ;;  %658 = vmatpush3.bf16.msra.mxu0 %v721_v19 }
  0x6c   :  { %659 = vmatprep.subr.bf16.mxu0 %v837_v0 }
  0x6f   :  { %660 = vmatpush3.bf16.msra.mxu0 %v722_v20 }
  0x70   :  { %661 = vmatprep.subr.bf16.mxu0 %v837_v0 }
  0x73   :  { %662 = vmatpush3.bf16.msra.mxu0 %v723_v21 }
  0x74   :  { %663 = vmatprep.subr.bf16.mxu0 %v837_v0 }
  0x77   :  { %664 = vmatpush3.bf16.msra.mxu0 %v724_v22 }
  0x78   :  { %665 = vmatprep.subr.bf16.mxu0 %v837_v0 }
  0x7b   :  { %666 = vmatpush3.bf16.msra.mxu0 %v725_v23 }
  0x7c   :  { %667 = vmatprep.subr.bf16.mxu0 %v837_v0 }
  0x7f   :  { %668 = vmatpush3.bf16.msra.mxu0 %v726_v24 }
  0x80   :  { %669 = vmatprep.subr.bf16.mxu0 %v837_v0 }
  0x83   :  { %670 = vmatpush3.bf16.msra.mxu0 %v727_v25 }
  0x84   :  { %671 = vmatprep.subr.bf16.mxu0 %v837_v0 }
  0x87   :  { %672 = vmatpush3.bf16.msra.mxu0 %v728_v33 }
 0x13d   :  { %v195_v27 = vpop.f32.mrb[0].mxu0 }
 0x13e   :  { %v196_v28 = vadd.f32 %v545_v26, %v195_v27  ;;  %v635_v29 = vpop.f32.mrb[1].mxu0 }
 0x13f   :  { %v198_v30 = vpop.f32.mrb[2].mxu0 }
 0x140   :  { %v201_v31 = vpack.c.bf16 %v196_v28, %v196_v28  ;;  %v636_v32 = vpop.f32.mrb[3].mxu0 }
 0x142   :  { %654 = vmatmul.mubr.bf16.vlgmr.msra.gmra.mrb[0].mxu1 %v201_v31 }
 0x143   :  { %693 = vmatprep.mubr.msk.bf16.mxu1 %vm838_vm0, %v837_v0  ;;  %678 = vmatpush3.bf16.msra.mxu1 %v729_v34 }
 0x144   :  { %679 = vmatprep.subr.bf16.mxu1 %v837_v0 }
 0x147   :  { %680 = vmatpush3.bf16.msra.mxu1 %v730_v35 }
 0x148   :  { %681 = vmatprep.subr.bf16.mxu1 %v837_v0 }
 0x14b   :  { %682 = vmatpush3.bf16.msra.mxu1 %v731_v36 }
 0x14c   :  { %683 = vmatprep.subr.bf16.mxu1 %v837_v0 }
 0x14f   :  { %684 = vmatpush3.bf16.msra.mxu1 %v732_v37 }
 0x150   :  { %685 = vmatprep.subr.bf16.mxu1 %v837_v0 }
 0x153   :  { %686 = vmatpush3.bf16.msra.mxu1 %v733_v38 }
 0x154   :  { %687 = vmatprep.subr.bf16.mxu1 %v837_v0 }
 0x157   :  { %688 = vmatpush3.bf16.msra.mxu1 %v734_v39 }
 0x158   :  { %689 = vmatprep.subr.bf16.mxu1 %v837_v0 }
 0x15b   :  { %690 = vmatpush3.bf16.msra.mxu1 %v735_v40 }
 0x15c   :  { %691 = vmatprep.subr.bf16.mxu1 %v837_v0 }
 0x15f   :  { %692 = vmatpush3.bf16.msra.mxu1 %v736_v48 }
 0x215   :  { %v307_v42 = vpop.f32.mrb[0].mxu1 }
 0x216   :  { %v308_v43 = vadd.f32 %v554_v41, %v307_v42  ;;  %v655_v44 = vpop.f32.mrb[1].mxu1 }
 0x217   :  { %v310_v45 = vpop.f32.mrb[2].mxu1 }
 0x218   :  { %v313_v46 = vpack.c.bf16 %v308_v43, %v308_v43  ;;  %v656_v47 = vpop.f32.mrb[3].mxu1 }
 0x21a   :  { %674 = vmatmul.mubr.bf16.vlgmr.msra.gmra.mrb[4].mxu0 %v313_v46 }
 0x2ed   :  { %v419_v50 = vpop.f32.mrb[4].mxu0 }
 0x2ee   :  { %v420_v51 = vadd.f32 %v563_v49, %v419_v50  ;;  %v675_v52 = vpop.f32.mrb[5].mxu0 }
 0x2ef   :  { %v422_v53 = vpop.f32.mrb[6].mxu0 }
 0x2f0   :  { %v425_v54 = vpack.c.bf16 %v420_v51, %v420_v51  ;;  %v676_v55 = vpop.f32.mrb[7].mxu0 }
 0x2f2   :  { %694 = vmatmul.mubr.bf16.vlgmr.msra.gmra.mrb[4].mxu1 %v425_v54 }
 0x3c5   :  { %v531_v57 = vpop.f32.mrb[4].mxu1 }
 0x3c6   :  { %v532_v58 = vadd.f32 %v572_v56, %v531_v57  ;;  %v695_v59 = vpop.f32.mrb[5].mxu1 }
 0x3c7   :  { %v534_v60 = vpop.f32.mrb[6].mxu1 }
 0x3c8   :  { %537 = vst [vmem:[%s1030_s9] sm:$0xff] %v532_v58  ;;  %v696_v61 = vpop.f32.mrb[7].mxu1 }
 0x3c9   :  { %542 = vsyncpa [#allocation3], 1 }
 0x3ca   :  { %543 = vsyncpa [#allocation5], 1 }
 0x3cb   :  { %544 = vsyncpa [#allocation8], 1 }

</bundles_post_ra>
